<compile_context>
chip_gen: v7x
topology: tpu7x:2x2x1
jax: 0.10.0
libtpu: 0.0.40
codegen_flags: <defaults>
</compile_context>

<pallas_src>
import jax
import jax.numpy as jnp
from jax.experimental import pallas as pl
from jax.experimental.pallas import tpu as pltpu

# Joint pairs from the PyTorch module (concat order matters):
# left_leg, right_leg, torso, left_arm, right_arm.
_PART_PAIRS = ((0, 1), (2, 3), (4, 5), (6, 7), (8, 9))
_NUM_JOINTS_USED = 10
_NUM_PARTS = 5

# Conservative defaults (used when the hardware query is unavailable).
_DEFAULT_ROW_TILE = 128     # B = N*C rows per block (sublane axis, mult of 8)
_DEFAULT_TIME_TILE = 1024   # time steps per block (lane axis, mult of 128)
_DEFAULT_VMEM_LIMIT = 32 * 1024 * 1024


def _hw_defaults():
    """Generation-aware tile sizes / VMEM limit with a safe fallback."""
    row_tile = _DEFAULT_ROW_TILE
    time_tile = _DEFAULT_TIME_TILE
    vmem_limit = _DEFAULT_VMEM_LIMIT
    try:
        cap = int(pltpu.get_tpu_info().vmem_capacity_bytes)
        # Headroom: never request more than half of physical VMEM.
        vmem_limit = min(cap // 2, 64 * 1024 * 1024)
        if cap >= 96 * 1024 * 1024:
            # v5e / v6e (128 MiB VMEM): grow the block to ~30 MiB
            # double-buffered at f32 to amortise per-step overhead.
            row_tile = 256
    except Exception:
        pass
    return row_tile, time_tile, vmem_limit


def _part2body_kernel(x_ref, o_ref):
    # x_ref: (10, TB, TT)   o_ref: (5, TB, TT)
    # Leading-axis joint selection -> 5 dense (TB, TT) slab ops on the VPU,
    # computed in the native dtype (no f32 upcast).
    for k in range(_NUM_PARTS):
        o_ref[k] = ((x_ref[2 * k] + x_ref[2 * k + 1]) * 0.5).astype(o_ref.dtype)


def _pick_tile(extent: int, preferred: int, align: int) -> int:
    """Full extent is always a legal block dim; otherwise use an aligned tile
    (a ragged last block is masked by Pallas)."""
    if extent <= preferred:
        return extent
    return max(align, (preferred // align) * align)


def _balance_for_megacore(b: int, t: int, tb: int, tt: int):
    """v7x has 2 TensorCores; with both grid axes 'parallel', make sure the
    grid has >= 2 steps when the shape allows so one core is not idle."""
    if pl.cdiv(b, tb) * pl.cdiv(t, tt) >= 2:
        return tb, tt
    if t >= 2 * 128:
        return tb, max(128, ((t // 2) // 128) * 128)
    if b >= 2 * 8:
        return max(8, ((b // 2) // 8) * 8), tt
    return tb, tt  # tiny shape: a single step is fine


def part2body_parts_leading(x_vbt, *, row_tile=None, time_tile=None):
    """Transpose-free core op: x_vbt is (10, B, T) -> (5, B, T).

    Use this entry point inside a model that keeps the joints-leading layout
    so no boundary transposes are needed at all."""
    nj, b, t = x_vbt.shape
    assert nj == _NUM_JOINTS_USED, "expected the 10 used joints on axis 0"

    def_row, def_time, vmem_limit = _hw_defaults()
    row_tile = def_row if row_tile is None else row_tile
    time_tile = def_time if time_tile is None else time_tile

    tb = _pick_tile(b, row_tile, 8)
    tt = _pick_tile(t, time_tile, 128)
    tb, tt = _balance_for_megacore(b, t, tb, tt)
    grid = (pl.cdiv(b, tb), pl.cdiv(t, tt))

    dsize = jnp.dtype(x_vbt.dtype).itemsize
    return pl.pallas_call(
        _part2body_kernel,
        out_shape=jax.ShapeDtypeStruct((_NUM_PARTS, b, t), x_vbt.dtype),
        grid=grid,
        in_specs=[
            pl.BlockSpec((_NUM_JOINTS_USED, tb, tt), lambda i, j: (0, i, j)),
        ],
        out_specs=pl.BlockSpec((_NUM_PARTS, tb, tt), lambda i, j: (0, i, j)),
        compiler_params=pltpu.CompilerParams(
            dimension_semantics=("parallel", "parallel"),
            vmem_limit_bytes=vmem_limit,
        ),
        cost_estimate=pl.CostEstimate(
            flops=2 * _NUM_PARTS * b * t,
            transcendentals=0,
            bytes_accessed=(_NUM_JOINTS_USED + _NUM_PARTS) * b * t * dsize,
        ),
    )(x_vbt)


def down_part2body(x, *, row_tile=None, time_tile=None):
    """PyTorch-compatible wrapper: (N, C, T, V) with V >= 10 -> (N, C, T, 5).

    TODO(synk): the two boundary transposes here exist only to honour the
    standalone nn.Module (N,C,T,V) contract and cost ~2x the kernel's HBM
    traffic; in the full model keep adjacent layers in the joints-leading
    (10, B, T) layout and call part2body_parts_leading directly."""
    n, c, t, v = x.shape
    assert v >= _NUM_JOINTS_USED, "need at least 10 joints on the last axis"
    b = n * c

    # Slice first, then reshape (free) + transpose: XLA fuses the joint slice
    # into the transpose copy, so this is one pass reading/writing 10*B*T
    # elements (not a separate full-V slice copy).
    x_vbt = jnp.transpose(
        x[..., :_NUM_JOINTS_USED].reshape(b, t, _NUM_JOINTS_USED), (2, 0, 1)
    )

    out_vbt = part2body_parts_leading(
        x_vbt, row_tile=row_tile, time_tile=time_tile
    )

    # Back to the PyTorch layout: (5, B, T) -> (N, C, T, 5).
    return jnp.transpose(out_vbt, (1, 2, 0)).reshape(n, c, t, _NUM_PARTS)


def _reference(x):
    """Pure-JAX reference mirroring the PyTorch forward exactly."""
    parts = [(x[..., a] + x[..., b]) * 0.5 for (a, b) in _PART_PAIRS]
    return jnp.stack(parts, axis=-1)


if __name__ == "__main__":
    key = jax.random.PRNGKey(0)
    key1, key2 = jax.random.split(key)

    # Small demo shape: N=2, C=4, T=16, V=16 (>=10 joints; only 0..9 used).
    x = jax.random.normal(key1, (2, 4, 16, 16), dtype=jnp.float32)
    out = jax.block_until_ready(down_part2body(x))
    ref = _reference(x)
    assert out.shape == (2, 4, 16, 5), out.shape
    assert jnp.allclose(out, ref, atol=1e-6, rtol=1e-6), "mismatch vs reference"

    # Second check exercises a multi-block "parallel" grid with full-size
    # (10, tb, 1024) / (5, tb, 1024) lane-dense tiles and the NTU-like V=12.
    x2 = jax.random.normal(key2, (2, 256, 1024, 12), dtype=jnp.float32)
    out2 = jax.block_until_ready(down_part2body(x2))
    ref2 = _reference(x2)
    assert out2.shape == (2, 256, 1024, 5), out2.shape
    assert jnp.allclose(out2, ref2, atol=1e-6, rtol=1e-6), "mismatch (tiled case)"

    print("KERNEL_OK")
</pallas_src>

<mosaic_0001>
module attributes {stable_mosaic.version = 11 : i64} {
  func.func @_part2body_kernel(%arg0: i32, %arg1: i32, %arg2: memref<10x8x16xf32, #tpu.memory_space<vmem>>, %arg3: memref<5x8x16xf32, #tpu.memory_space<vmem>>) attributes {dimension_semantics = [#tpu.dimension_semantics<parallel>, #tpu.dimension_semantics<parallel>], iteration_bounds = array<i64: 1, 1>, scalar_prefetch = 0 : i64, scratch_operands = 0 : i64, tpu.core_type = #tpu.core_type<tc>, window_params = [{transform_indices = @transform_0, window_bounds = array<i64: 10, 8, 16>}, {transform_indices = @transform_1, window_bounds = array<i64: 5, 8, 16>}]} {
    %c0 = arith.constant 0 : index
    %c0_0 = arith.constant 0 : index
    %c0_1 = arith.constant 0 : index
    %0 = vector.load %arg2[%c0, %c0_0, %c0_1] : memref<10x8x16xf32, #tpu.memory_space<vmem>>, vector<1x8x16xf32>
    %1 = vector.shape_cast %0 : vector<1x8x16xf32> to vector<8x16xf32>
    %c1 = arith.constant 1 : index
    %c0_2 = arith.constant 0 : index
    %c0_3 = arith.constant 0 : index
    %2 = vector.load %arg2[%c1, %c0_2, %c0_3] : memref<10x8x16xf32, #tpu.memory_space<vmem>>, vector<1x8x16xf32>
    %3 = vector.shape_cast %2 : vector<1x8x16xf32> to vector<8x16xf32>
    %4 = arith.addf %1, %3 : vector<8x16xf32>
    %cst = arith.constant 5.000000e-01 : f32
    %5 = vector.broadcast %cst : f32 to vector<8x16xf32>
    %6 = arith.mulf %4, %5 : vector<8x16xf32>
    %c0_4 = arith.constant 0 : index
    %c0_5 = arith.constant 0 : index
    %c0_6 = arith.constant 0 : index
    %7 = vector.load %arg3[%c0_4, %c0_5, %c0_6] : memref<5x8x16xf32, #tpu.memory_space<vmem>>, vector<1x8x16xf32>
    %8 = vector.shape_cast %7 : vector<1x8x16xf32> to vector<8x16xf32>
    %9 = vector.shape_cast %6 : vector<8x16xf32> to vector<1x8x16xf32>
    tpu.vector_store %arg3[%c0_4, %c0_5, %c0_6], %9 {strides = array<i32>} : memref<5x8x16xf32, #tpu.memory_space<vmem>>, vector<1x8x16xf32>,
    %c2 = arith.constant 2 : index
    %c0_7 = arith.constant 0 : index
    %c0_8 = arith.constant 0 : index
    %10 = vector.load %arg2[%c2, %c0_7, %c0_8] : memref<10x8x16xf32, #tpu.memory_space<vmem>>, vector<1x8x16xf32>
    %11 = vector.shape_cast %10 : vector<1x8x16xf32> to vector<8x16xf32>
    %c3 = arith.constant 3 : index
    %c0_9 = arith.constant 0 : index
    %c0_10 = arith.constant 0 : index
    %12 = vector.load %arg2[%c3, %c0_9, %c0_10] : memref<10x8x16xf32, #tpu.memory_space<vmem>>, vector<1x8x16xf32>
    %13 = vector.shape_cast %12 : vector<1x8x16xf32> to vector<8x16xf32>
    %14 = arith.addf %11, %13 : vector<8x16xf32>
    %cst_11 = arith.constant 5.000000e-01 : f32
    %15 = vector.broadcast %cst_11 : f32 to vector<8x16xf32>
    %16 = arith.mulf %14, %15 : vector<8x16xf32>
    %c1_12 = arith.constant 1 : index
    %c0_13 = arith.constant 0 : index
    %c0_14 = arith.constant 0 : index
    %17 = vector.load %arg3[%c1_12, %c0_13, %c0_14] : memref<5x8x16xf32, #tpu.memory_space<vmem>>, vector<1x8x16xf32>
    %18 = vector.shape_cast %17 : vector<1x8x16xf32> to vector<8x16xf32>
    %19 = vector.shape_cast %16 : vector<8x16xf32> to vector<1x8x16xf32>
    tpu.vector_store %arg3[%c1_12, %c0_13, %c0_14], %19 {strides = array<i32>} : memref<5x8x16xf32, #tpu.memory_space<vmem>>, vector<1x8x16xf32>,
    %c4 = arith.constant 4 : index
    %c0_15 = arith.constant 0 : index
    %c0_16 = arith.constant 0 : index
    %20 = vector.load %arg2[%c4, %c0_15, %c0_16] : memref<10x8x16xf32, #tpu.memory_space<vmem>>, vector<1x8x16xf32>
    %21 = vector.shape_cast %20 : vector<1x8x16xf32> to vector<8x16xf32>
    %c5 = arith.constant 5 : index
    %c0_17 = arith.constant 0 : index
    %c0_18 = arith.constant 0 : index
    %22 = vector.load %arg2[%c5, %c0_17, %c0_18] : memref<10x8x16xf32, #tpu.memory_space<vmem>>, vector<1x8x16xf32>
    %23 = vector.shape_cast %22 : vector<1x8x16xf32> to vector<8x16xf32>
    %24 = arith.addf %21, %23 : vector<8x16xf32>
    %cst_19 = arith.constant 5.000000e-01 : f32
    %25 = vector.broadcast %cst_19 : f32 to vector<8x16xf32>
    %26 = arith.mulf %24, %25 : vector<8x16xf32>
    %c2_20 = arith.constant 2 : index
    %c0_21 = arith.constant 0 : index
    %c0_22 = arith.constant 0 : index
    %27 = vector.load %arg3[%c2_20, %c0_21, %c0_22] : memref<5x8x16xf32, #tpu.memory_space<vmem>>, vector<1x8x16xf32>
    %28 = vector.shape_cast %27 : vector<1x8x16xf32> to vector<8x16xf32>
    %29 = vector.shape_cast %26 : vector<8x16xf32> to vector<1x8x16xf32>
    tpu.vector_store %arg3[%c2_20, %c0_21, %c0_22], %29 {strides = array<i32>} : memref<5x8x16xf32, #tpu.memory_space<vmem>>, vector<1x8x16xf32>,
    %c6 = arith.constant 6 : index
    %c0_23 = arith.constant 0 : index
    %c0_24 = arith.constant 0 : index
    %30 = vector.load %arg2[%c6, %c0_23, %c0_24] : memref<10x8x16xf32, #tpu.memory_space<vmem>>, vector<1x8x16xf32>
    %31 = vector.shape_cast %30 : vector<1x8x16xf32> to vector<8x16xf32>
    %c7 = arith.constant 7 : index
    %c0_25 = arith.constant 0 : index
    %c0_26 = arith.constant 0 : index
    %32 = vector.load %arg2[%c7, %c0_25, %c0_26] : memref<10x8x16xf32, #tpu.memory_space<vmem>>, vector<1x8x16xf32>
    %33 = vector.shape_cast %32 : vector<1x8x16xf32> to vector<8x16xf32>
    %34 = arith.addf %31, %33 : vector<8x16xf32>
    %cst_27 = arith.constant 5.000000e-01 : f32
    %35 = vector.broadcast %cst_27 : f32 to vector<8x16xf32>
    %36 = arith.mulf %34, %35 : vector<8x16xf32>
    %c3_28 = arith.constant 3 : index
    %c0_29 = arith.constant 0 : index
    %c0_30 = arith.constant 0 : index
    %37 = vector.load %arg3[%c3_28, %c0_29, %c0_30] : memref<5x8x16xf32, #tpu.memory_space<vmem>>, vector<1x8x16xf32>
    %38 = vector.shape_cast %37 : vector<1x8x16xf32> to vector<8x16xf32>
    %39 = vector.shape_cast %36 : vector<8x16xf32> to vector<1x8x16xf32>
    tpu.vector_store %arg3[%c3_28, %c0_29, %c0_30], %39 {strides = array<i32>} : memref<5x8x16xf32, #tpu.memory_space<vmem>>, vector<1x8x16xf32>,
    %c8 = arith.constant 8 : index
    %c0_31 = arith.constant 0 : index
    %c0_32 = arith.constant 0 : index
    %40 = vector.load %arg2[%c8, %c0_31, %c0_32] : memref<10x8x16xf32, #tpu.memory_space<vmem>>, vector<1x8x16xf32>
    %41 = vector.shape_cast %40 : vector<1x8x16xf32> to vector<8x16xf32>
    %c9 = arith.constant 9 : index
    %c0_33 = arith.constant 0 : index
    %c0_34 = arith.constant 0 : index
    %42 = vector.load %arg2[%c9, %c0_33, %c0_34] : memref<10x8x16xf32, #tpu.memory_space<vmem>>, vector<1x8x16xf32>
    %43 = vector.shape_cast %42 : vector<1x8x16xf32> to vector<8x16xf32>
    %44 = arith.addf %41, %43 : vector<8x16xf32>
    %cst_35 = arith.constant 5.000000e-01 : f32
    %45 = vector.broadcast %cst_35 : f32 to vector<8x16xf32>
    %46 = arith.mulf %44, %45 : vector<8x16xf32>
    %c4_36 = arith.constant 4 : index
    %c0_37 = arith.constant 0 : index
    %c0_38 = arith.constant 0 : index
    %47 = vector.load %arg3[%c4_36, %c0_37, %c0_38] : memref<5x8x16xf32, #tpu.memory_space<vmem>>, vector<1x8x16xf32>
    %48 = vector.shape_cast %47 : vector<1x8x16xf32> to vector<8x16xf32>
    %49 = vector.shape_cast %46 : vector<8x16xf32> to vector<1x8x16xf32>
    tpu.vector_store %arg3[%c4_36, %c0_37, %c0_38], %49 {strides = array<i32>} : memref<5x8x16xf32, #tpu.memory_space<vmem>>, vector<1x8x16xf32>,
    return
  }
  func.func @transform_0(%arg0: i32, %arg1: i32) -> (i32, i32, i32) {
    %c0_i32 = arith.constant 0 : i32
    %c0_i32_0 = arith.constant 0 : i32
    return %c0_i32, %arg0, %arg1 : i32, i32, i32
  }
  func.func @transform_1(%arg0: i32, %arg1: i32) -> (i32, i32, i32) {
    %c0_i32 = arith.constant 0 : i32
    %c0_i32_0 = arith.constant 0 : i32
    return %c0_i32, %arg0, %arg1 : i32, i32, i32
  }
}

</mosaic_0001>

<bundles_post_ra>
// kernel: tpu_custom_call.1
= control target key start
LH: loop header
LB: loop body
LE: loop exit
PB: predicated region body
PF: predicated region fallthrough
CT: control target
= control target key end

     0   :  { %6 = vsyncpa [#allocation3], 0  ;;  %s180_s0 = inlined_call_operand.hbm [shape: f32[10,8,16], index: 0, kind: input, shape index: {}]   ;;  %s181_s1 = inlined_call_operand.hbm [shape: f32[5,8,16], index: 1, kind: output, shape index: {}]  }
   0x1   :  { %7 = vsyncpa [#allocation4], 0  ;;  %s131_s6 = smov [#allocation2]   ;;  %s83_s10 = scalar_lea.hbm %s180_s0, 1280 }
   0x2   :  { %s13_s7 = sshll.u32 %s131_s6, 4  ;;  %p84_p0 = scmp.ne.s32.totalorder %s180_s0, %s83_s10  ;;  %s14_s7 = int_to_ptr.vmem [resolvable:$true] %s13_s7 }
   0x3   :  { %p87_p1 = scmp.lt.u32.totalorder %s83_s10, %s180_s0 }
   0x5   :  { %p89_p2 = pnand %p87_p1, %p84_p0 }
   0x7   :  { %92 = shalt.err (!%p89_p2)
}
   0x8   :  { %s93_s15 = scalar_lea.vmem %s14_s7, 1280  ;;  %p98_p4 = scmp.lt.s32.totalorder %s14_s7, %s14_s7 }
   0x9   :  { %p94_p3 = scmp.ne.s32.totalorder %s14_s7, %s93_s15  ;;  %p99_p5 = scmp.lt.s32.totalorder %s93_s15, %s93_s15 }
   0xb   :  { %p100_p6 = por %p99_p5, %p98_p4 }
   0xd   :  { %p101_p7 = pnand %p100_p6, %p94_p3 }
   0xf   :  { %104 = shalt.err (!%p101_p7)
}
  0x10   :  { %s132_s16 = smov 128   ;;  %s133_s17 = smov 8  }
  0x11   :  { %19 = dma.hbm_to_vmem [thread:$0]  %s180_s0, 1280, %s14_s7, [#allocation3], %s132_s16, %s132_s16, %s133_s17  }
  0x12   :  { %127 = dma.done.wait [#allocation3], 1280  }
  0x13   :  { %128 = vsyncadd [#allocation3], 4294966016  ;;  %v23_v0 = vld [vmem:[#allocation2] sm:$0xff]  ;;  %v25_v1 = vld [vmem:[#allocation2 + $0x8] sm:$0xff]  ;;  %vm28_vm0 = vcmask 130048   ;;  %s134_s20 = smov [#allocation5]  }
  0x14   :  { %v31_v2 = vld [vmem:[#allocation2 + $0x10] sm:$0xff]  ;;  %v26_v3 = vadd.f32 %v25_v1, %v23_v0  ;;  %v33_v4 = vld [vmem:[#allocation2 + $0x18] sm:$0xff]  ;;  %v39_v5 = vld [vmem:[#allocation2 + $0x20] sm:$0xff]  ;;  %s67_s0 = sshll.u32 %s134_s20, 4  ;;  %s68_s0 = int_to_ptr.vmem [resolvable:$true] %s67_s0 }
  0x15   :  { %v41_v6 = vld [vmem:[#allocation2 + $0x28] sm:$0xff]  ;;  %v34_v7 = vadd.f32 %v33_v4, %v31_v2  ;;  %v47_v9 = vld [vmem:[#allocation2 + $0x30] sm:$0xff]  ;;  %v49_v10 = vld [vmem:[#allocation2 + $0x38] sm:$0xff]  ;;  %s105_s21 = scalar_lea.vmem %s68_s0, 640  ;;  %p110_p9 = scmp.lt.s32.totalorder %s68_s0, %s68_s0 }
  0x16   :  { %v42_v8 = vadd.f32 %v41_v6, %v39_v5  ;;  %v55_v11 = vld [vmem:[#allocation2 + $0x40] sm:$0xff]  ;;  %v27_v12 = vmul.f32 0.5, %v26_v3  ;;  %v50_v13 = vadd.f32 %v49_v10, %v47_v9  ;;  %v57_v14 = vld [vmem:[#allocation2 + $0x48] sm:$0xff]  ;;  %p106_p8 = scmp.ne.s32.totalorder %s68_s0, %s105_s21  ;;  %p111_p10 = scmp.lt.s32.totalorder %s105_s21, %s105_s21 }
  0x17   :  { %v35_v15 = vmul.f32 0.5, %v34_v7  ;;  %v58_v17 = vadd.f32 %v57_v14, %v55_v11 }
  0x18   :  { %v43_v16 = vmul.f32 0.5, %v42_v8  ;;  %29 = vst.msk [vmem:[#allocation5] sm:$0xff] %vm28_vm0, %v27_v12  ;;  %v51_v18 = vmul.f32 0.5, %v50_v13  ;;  %p112_p11 = por %p111_p10, %p110_p9 }
  0x19   :  { %37 = vst.msk [vmem:[#allocation5 + $0x8] sm:$0xff] %vm28_vm0, %v35_v15  ;;  %v59_v19 = vmul.f32 0.5, %v58_v17 }
  0x1a   :  { %45 = vst.msk [vmem:[#allocation5 + $0x10] sm:$0xff] %vm28_vm0, %v43_v16  ;;  %53 = vst.msk [vmem:[#allocation5 + $0x18] sm:$0xff] %vm28_vm0, %v51_v18  ;;  %p113_p12 = pnand %p112_p11, %p106_p8 }
  0x1b   :  { %61 = vst.msk [vmem:[#allocation5 + $0x20] sm:$0xff] %vm28_vm0, %v59_v19 }
  0x1c   :  { %116 = shalt.err (!%p113_p12)
}
  0x1d   :  { %s117_s24 = scalar_lea.hbm %s181_s1, 640 }
  0x1e   :  { %p118_p13 = scmp.ne.s32.totalorder %s181_s1, %s117_s24  ;;  %p121_p0 = scmp.lt.u32.totalorder %s117_s24, %s181_s1 }
  0x20   :  { %p123_p1 = pnand %p121_p0, %p118_p13 }
  0x22   :  { %126 = shalt.err (!%p123_p1)
}
  0x23   :  { %73 = dma.vmem_to_hbm [thread:$0]  %s68_s0, 640, %s181_s1, [#allocation4], %s132_s16, %s132_s16, %s133_s17  }
  0x24   :  { %129 = dma.done.wait [#allocation4], 640  }
  0x25   :  { %130 = vsyncadd [#allocation4], 4294966656 }
  0x26   :  { %77 = vsyncpa [#allocation3], 1 }
  0x27   :  { %78 = vsyncpa [#allocation4], 1 }

</bundles_post_ra>
